<compile_context>
chip_gen: v6e
topology: v6e:2x2x1
jax: 0.10.0
libtpu: 0.0.40
codegen_flags: <defaults>
</compile_context>

<pallas_src>
import math
import functools

import jax
import jax.numpy as jnp
from jax.experimental import pallas as pl
from jax.experimental.pallas import tpu as pltpu

# ----------------------------- model dims ------------------------------
B = 2          # batch
S = 8          # sequence length
D = 32         # hidden size
H = 4          # attention heads
DH = D // H    # per-head dim
F = 64         # FFN inner size
EPS = 1e-5


def _layernorm(x, g, b):
    mu = jnp.mean(x, axis=-1, keepdims=True)
    var = jnp.mean((x - mu) ** 2, axis=-1, keepdims=True)
    return (x - mu) * jax.lax.rsqrt(var + EPS) * g + b


# ------------------------------ kernel ---------------------------------
def encoder_kernel(x_ref,        # (B*S, D)
                   wqkv_ref,     # (D, 3D)   [Wq*scale | Wk | Wv]
                   bqkv_ref,     # (1, 3D)   [bq*scale | bk | bv]
                   wo_ref,       # (D, D)
                   w1_ref,       # (D, F)
                   bf1_ref,      # (1, F)
                   w2_ref,       # (F, D)
                   vec_ref,      # (6, D): bo, ln1_g, ln1_b, bf2, ln2_g, ln2_b
                   o_ref,        # (B*S, D)
                   ctx_scr,      # VMEM scratch (B*S, D) f32
                   *, batch, seq, num_heads, head_dim):
    d = num_heads * head_dim
    xf = x_ref[...].astype(jnp.float32)                  # (R, D), R = B*S

    vec = vec_ref[...]                                   # (6, D) lane-dense block
    bo, g1, be1, bf2, g2, be2 = (vec[i:i + 1, :] for i in range(6))

    # ---- fused QKV projection: one well-shaped MXU op (scale pre-folded) ----
    # TODO(synk): at production D, cast MXU operands to bf16 (f32 accumulate);
    # keep softmax/LayerNorm elementwise math in f32 (v5e has no bf16 VPU/EUP).
    qkv = jnp.dot(xf, wqkv_ref[...],
                  preferred_element_type=jnp.float32) + bqkv_ref[...]   # (R, 3D)

    # ---- per-head attention (static unroll, H=4) ----
    # Single-batch-dim einsums only: the two-batch-dim 'bqhd,bkhd->bhqk' form
    # is not robustly supported by Mosaic's dot_general/transpose lowering.
    for h in range(num_heads):
        c0 = h * head_dim
        qh = qkv[:, c0:c0 + head_dim].reshape(batch, seq, head_dim)
        kh = qkv[:, d + c0:d + c0 + head_dim].reshape(batch, seq, head_dim)
        vh = qkv[:, 2 * d + c0:2 * d + c0 + head_dim].reshape(batch, seq, head_dim)

        s = jnp.einsum('bqd,bkd->bqk', qh, kh,
                       preferred_element_type=jnp.float32)       # scale already folded
        s = s - jnp.max(s, axis=-1, keepdims=True)
        p = jnp.exp(s)
        p = p / jnp.sum(p, axis=-1, keepdims=True)               # exact divide

        ctx = jnp.einsum('bqk,bkd->bqd', p, vh,
                         preferred_element_type=jnp.float32)
        ctx_scr[:, c0:c0 + head_dim] = ctx.reshape(batch * seq, head_dim)

    # ---- single output projection over the assembled (R, D) context ----
    attn = jnp.dot(ctx_scr[...], wo_ref[...],
                   preferred_element_type=jnp.float32) + bo

    x1 = _layernorm(xf + attn, g1, be1)

    h1 = jnp.dot(x1, w1_ref[...], preferred_element_type=jnp.float32) + bf1_ref[...]
    h1 = jnp.maximum(h1, 0.0)                                    # ReLU
    h2 = jnp.dot(h1, w2_ref[...], preferred_element_type=jnp.float32) + bf2

    x2 = _layernorm(x1 + h2, g2, be2)
    o_ref[...] = x2.astype(o_ref.dtype)


# ----------------------- one-time parameter packing ----------------------
def pack_params(params):
    """Repack raw parameters ONCE at load time (not inside the jitted forward)."""
    (wq, bq, wk, bk, wv, bv, wo, bo,
     g1, be1, w1, bf1, w2, bf2, g2, be2) = params
    scale = 1.0 / math.sqrt(DH)
    wqkv = jnp.concatenate([wq * scale, wk, wv], axis=1)           # (D, 3D)
    bqkv = jnp.concatenate([bq * scale, bk, bv], axis=1)           # (1, 3D)
    vec = jnp.concatenate([bo, g1, be1, bf2, g2, be2], axis=0)     # (6, D)
    return (wqkv, bqkv, wo, w1, bf1, w2, vec)


# ----------------------------- forward ----------------------------------
@jax.jit
def encode_layer(embedding, packed):
    """embedding: [B, S, D] float32 -> [B, S, D] float32."""
    wqkv, bqkv, wo, w1, bf1, w2, vec = packed
    b, s, d = embedding.shape
    nh, dh = H, d // H

    x2d = embedding.reshape(b * s, d)            # lane-dense (B*S, D) slab

    kernel = functools.partial(encoder_kernel, batch=b, seq=s,
                               num_heads=nh, head_dim=dh)

    # Single invocation: everything resident in VMEM at these toy shapes.
    # TODO(synk): at production shapes add a row-tiled grid (tile 256-512)
    # with dimension_semantics=("parallel",) for v7x's 2 TCs, budget tiles
    # against 64 MiB VMEM, and set vmem_limit_bytes in pltpu.CompilerParams.
    out2d = pl.pallas_call(
        kernel,
        out_shape=jax.ShapeDtypeStruct((b * s, d), embedding.dtype),
        scratch_shapes=[pltpu.VMEM((b * s, d), jnp.float32)],
    )(x2d, wqkv, bqkv, wo, w1, bf1, w2, vec)

    return out2d.reshape(b, s, d)


# --------------------------- pure-JAX reference --------------------------
def encode_layer_ref(x, params):
    (wq, bq, wk, bk, wv, bv, wo, bo,
     g1, be1, w1, bf1, w2, bf2, g2, be2) = params
    q = x @ wq + bq
    k = x @ wk + bk
    v = x @ wv + bv
    qh = q.reshape(B, S, H, DH).transpose(0, 2, 1, 3)
    kh = k.reshape(B, S, H, DH).transpose(0, 2, 1, 3)
    vh = v.reshape(B, S, H, DH).transpose(0, 2, 1, 3)
    s = jnp.einsum("bhqd,bhkd->bhqk", qh, kh) / math.sqrt(DH)
    p = jax.nn.softmax(s, axis=-1)
    a = jnp.einsum("bhqk,bhkd->bhqd", p, vh)
    a = a.transpose(0, 2, 1, 3).reshape(B, S, D)
    a = a @ wo + bo
    x1 = _layernorm(x + a, g1, be1)
    h = jnp.maximum(x1 @ w1 + bf1, 0.0) @ w2 + bf2
    return _layernorm(x1 + h, g2, be2)


# ------------------------------ main -------------------------------------
if __name__ == "__main__":
    key = jax.random.PRNGKey(0)
    keys = jax.random.split(key, 8)

    # Deterministic synthetic parameters (weights stored as (in, out)).
    wq = jax.random.normal(keys[0], (D, D), jnp.float32) * 0.1
    wk = jax.random.normal(keys[1], (D, D), jnp.float32) * 0.1
    wv = jax.random.normal(keys[2], (D, D), jnp.float32) * 0.1
    wo = jax.random.normal(keys[3], (D, D), jnp.float32) * 0.1
    w1 = jax.random.normal(keys[4], (D, F), jnp.float32) * 0.1
    w2 = jax.random.normal(keys[5], (F, D), jnp.float32) * 0.1
    bq = jnp.zeros((1, D), jnp.float32)
    bk = jnp.zeros((1, D), jnp.float32)
    bv = jnp.zeros((1, D), jnp.float32)
    bo = jnp.zeros((1, D), jnp.float32)
    bf1 = jnp.zeros((1, F), jnp.float32)
    bf2 = jnp.zeros((1, D), jnp.float32)
    g1 = jnp.ones((1, D), jnp.float32)
    be1 = jnp.zeros((1, D), jnp.float32)
    g2 = jnp.ones((1, D), jnp.float32)
    be2 = jnp.zeros((1, D), jnp.float32)

    params = (wq, bq, wk, bk, wv, bv, wo, bo,
              g1, be1, w1, bf1, w2, bf2, g2, be2)

    # Pack once at parameter-load time (hoisted out of the jitted forward).
    packed = jax.tree_util.tree_map(jax.block_until_ready, pack_params(params))

    embedding = jax.random.normal(keys[6], (B, S, D), jnp.float32)

    out = jax.block_until_ready(encode_layer(embedding, packed))
    ref = encode_layer_ref(embedding, params)

    assert out.shape == (B, S, D)
    # Exact softmax divide restored -> tight tolerance again.
    assert jnp.allclose(out, ref, atol=1e-4, rtol=1e-4), "mismatch vs reference"

    # TODO(synk): EncodeLayer dispatches to globals()[config.task.model_name];
    # only the canonical Transformer encoder block is implemented here.
    print("KERNEL_OK")
</pallas_src>

<mosaic_0001>
module attributes {stable_mosaic.version = 11 : i64} {
  func.func @encoder_kernel(%arg0: memref<16x32xf32, #tpu.memory_space<vmem>>, %arg1: memref<32x96xf32, #tpu.memory_space<vmem>>, %arg2: memref<1x96xf32, #tpu.memory_space<vmem>>, %arg3: memref<32x32xf32, #tpu.memory_space<vmem>>, %arg4: memref<32x64xf32, #tpu.memory_space<vmem>>, %arg5: memref<1x64xf32, #tpu.memory_space<vmem>>, %arg6: memref<64x32xf32, #tpu.memory_space<vmem>>, %arg7: memref<6x32xf32, #tpu.memory_space<vmem>>, %arg8: memref<16x32xf32, #tpu.memory_space<vmem>>, %arg9: memref<16x32xf32, #tpu.memory_space<vmem>>) attributes {dimension_semantics = [], scalar_prefetch = 0 : i64, scratch_operands = 1 : i64, tpu.core_type = #tpu.core_type<tc>} {
    %c0 = arith.constant 0 : index
    %c0_0 = arith.constant 0 : index
    %0 = vector.load %arg0[%c0, %c0_0] : memref<16x32xf32, #tpu.memory_space<vmem>>, vector<16x32xf32>
    %c0_1 = arith.constant 0 : index
    %c0_2 = arith.constant 0 : index
    %1 = vector.load %arg7[%c0_1, %c0_2] : memref<6x32xf32, #tpu.memory_space<vmem>>, vector<6x32xf32>
    %2 = vector.extract_strided_slice %1 {offsets = [0, 0], sizes = [1, 32], strides = [1, 1]} : vector<6x32xf32> to vector<1x32xf32>
    %3 = vector.extract_strided_slice %1 {offsets = [1, 0], sizes = [1, 32], strides = [1, 1]} : vector<6x32xf32> to vector<1x32xf32>
    %4 = vector.extract_strided_slice %1 {offsets = [2, 0], sizes = [1, 32], strides = [1, 1]} : vector<6x32xf32> to vector<1x32xf32>
    %5 = vector.extract_strided_slice %1 {offsets = [3, 0], sizes = [1, 32], strides = [1, 1]} : vector<6x32xf32> to vector<1x32xf32>
    %6 = vector.extract_strided_slice %1 {offsets = [4, 0], sizes = [1, 32], strides = [1, 1]} : vector<6x32xf32> to vector<1x32xf32>
    %7 = vector.extract_strided_slice %1 {offsets = [5, 0], sizes = [1, 32], strides = [1, 1]} : vector<6x32xf32> to vector<1x32xf32>
    %c0_3 = arith.constant 0 : index
    %c0_4 = arith.constant 0 : index
    %8 = vector.load %arg1[%c0_3, %c0_4] : memref<32x96xf32, #tpu.memory_space<vmem>>, vector<32x96xf32>
    %cst = arith.constant dense<0.000000e+00> : vector<16x96xf32>
    %9 = tpu.matmul %0, %8, %cst {dimension_numbers = #tpu.dot_dimension_numbers<[1], [0], [0], [1], [0, 0, 1, 1], [], []>} : vector<16x32xf32>, vector<32x96xf32>, vector<16x96xf32> -> vector<16x96xf32>
    %c0_5 = arith.constant 0 : index
    %c0_6 = arith.constant 0 : index
    %10 = vector.load %arg2[%c0_5, %c0_6] : memref<1x96xf32, #tpu.memory_space<vmem>>, vector<1x96xf32>
    %11 = vector.broadcast %10 : vector<1x96xf32> to vector<16x96xf32>
    %12 = arith.addf %9, %11 : vector<16x96xf32>
    %13 = vector.extract_strided_slice %12 {offsets = [0, 0], sizes = [16, 8], strides = [1, 1]} : vector<16x96xf32> to vector<16x8xf32>
    %14 = vector.shape_cast %13 : vector<16x8xf32> to vector<2x8x8xf32>
    %15 = vector.extract_strided_slice %12 {offsets = [0, 32], sizes = [16, 8], strides = [1, 1]} : vector<16x96xf32> to vector<16x8xf32>
    %16 = vector.shape_cast %15 : vector<16x8xf32> to vector<2x8x8xf32>
    %17 = vector.extract_strided_slice %12 {offsets = [0, 64], sizes = [16, 8], strides = [1, 1]} : vector<16x96xf32> to vector<16x8xf32>
    %18 = vector.shape_cast %17 : vector<16x8xf32> to vector<2x8x8xf32>
    "tpu.trace_start"() <{level = 10 : i32, message = "bqd,bkd->bqk"}> : () -> ()
    %cst_7 = arith.constant dense<0.000000e+00> : vector<2x8x8xf32>
    %19 = tpu.matmul %14, %16, %cst_7 {dimension_numbers = #tpu.dot_dimension_numbers<[2], [2], [1], [1], [0, 0, 0, 1, 1, 1], [0], [0]>} : vector<2x8x8xf32>, vector<2x8x8xf32>, vector<2x8x8xf32> -> vector<2x8x8xf32>
    "tpu.trace_stop"() : () -> ()
    %cst_8 = arith.constant dense<0xFF800000> : vector<2x8xf32>
    %20 = vector.multi_reduction <maximumf>, %19, %cst_8 [2] : vector<2x8x8xf32> to vector<2x8xf32>
    %21 = vector.shape_cast %20 : vector<2x8xf32> to vector<2x8x1xf32>
    %22 = vector.broadcast %21 : vector<2x8x1xf32> to vector<2x8x8xf32>
    %23 = arith.subf %19, %22 : vector<2x8x8xf32>
    %24 = math.exp %23 : vector<2x8x8xf32>
    %cst_9 = arith.constant dense<0.000000e+00> : vector<2x8xf32>
    %25 = vector.multi_reduction <add>, %24, %cst_9 [2] : vector<2x8x8xf32> to vector<2x8xf32>
    %26 = vector.shape_cast %25 : vector<2x8xf32> to vector<2x8x1xf32>
    %27 = vector.broadcast %26 : vector<2x8x1xf32> to vector<2x8x8xf32>
    %28 = arith.divf %24, %27 : vector<2x8x8xf32>
    "tpu.trace_start"() <{level = 10 : i32, message = "bqk,bkd->bqd"}> : () -> ()
    %cst_10 = arith.constant dense<0.000000e+00> : vector<2x8x8xf32>
    %29 = tpu.matmul %28, %18, %cst_10 {dimension_numbers = #tpu.dot_dimension_numbers<[2], [1], [1], [2], [0, 0, 0, 1, 1, 2], [0], [0]>} : vector<2x8x8xf32>, vector<2x8x8xf32>, vector<2x8x8xf32> -> vector<2x8x8xf32>
    "tpu.trace_stop"() : () -> ()
    %30 = vector.shape_cast %29 : vector<2x8x8xf32> to vector<16x8xf32>
    %c0_11 = arith.constant 0 : index
    %c0_12 = arith.constant 0 : index
    %31 = vector.load %arg9[%c0_11, %c0_12] : memref<16x32xf32, #tpu.memory_space<vmem>>, vector<16x8xf32>
    tpu.vector_store %arg9[%c0_11, %c0_12], %30 {strides = array<i32>} : memref<16x32xf32, #tpu.memory_space<vmem>>, vector<16x8xf32>,
    %32 = vector.extract_strided_slice %12 {offsets = [0, 8], sizes = [16, 8], strides = [1, 1]} : vector<16x96xf32> to vector<16x8xf32>
    %33 = vector.shape_cast %32 : vector<16x8xf32> to vector<2x8x8xf32>
    %34 = vector.extract_strided_slice %12 {offsets = [0, 40], sizes = [16, 8], strides = [1, 1]} : vector<16x96xf32> to vector<16x8xf32>
    %35 = vector.shape_cast %34 : vector<16x8xf32> to vector<2x8x8xf32>
    %36 = vector.extract_strided_slice %12 {offsets = [0, 72], sizes = [16, 8], strides = [1, 1]} : vector<16x96xf32> to vector<16x8xf32>
    %37 = vector.shape_cast %36 : vector<16x8xf32> to vector<2x8x8xf32>
    "tpu.trace_start"() <{level = 10 : i32, message = "bqd,bkd->bqk"}> : () -> ()
    %cst_13 = arith.constant dense<0.000000e+00> : vector<2x8x8xf32>
    %38 = tpu.matmul %33, %35, %cst_13 {dimension_numbers = #tpu.dot_dimension_numbers<[2], [2], [1], [1], [0, 0, 0, 1, 1, 1], [0], [0]>} : vector<2x8x8xf32>, vector<2x8x8xf32>, vector<2x8x8xf32> -> vector<2x8x8xf32>
    "tpu.trace_stop"() : () -> ()
    %cst_14 = arith.constant dense<0xFF800000> : vector<2x8xf32>
    %39 = vector.multi_reduction <maximumf>, %38, %cst_14 [2] : vector<2x8x8xf32> to vector<2x8xf32>
    %40 = vector.shape_cast %39 : vector<2x8xf32> to vector<2x8x1xf32>
    %41 = vector.broadcast %40 : vector<2x8x1xf32> to vector<2x8x8xf32>
    %42 = arith.subf %38, %41 : vector<2x8x8xf32>
    %43 = math.exp %42 : vector<2x8x8xf32>
    %cst_15 = arith.constant dense<0.000000e+00> : vector<2x8xf32>
    %44 = vector.multi_reduction <add>, %43, %cst_15 [2] : vector<2x8x8xf32> to vector<2x8xf32>
    %45 = vector.shape_cast %44 : vector<2x8xf32> to vector<2x8x1xf32>
    %46 = vector.broadcast %45 : vector<2x8x1xf32> to vector<2x8x8xf32>
    %47 = arith.divf %43, %46 : vector<2x8x8xf32>
    "tpu.trace_start"() <{level = 10 : i32, message = "bqk,bkd->bqd"}> : () -> ()
    %cst_16 = arith.constant dense<0.000000e+00> : vector<2x8x8xf32>
    %48 = tpu.matmul %47, %37, %cst_16 {dimension_numbers = #tpu.dot_dimension_numbers<[2], [1], [1], [2], [0, 0, 0, 1, 1, 2], [0], [0]>} : vector<2x8x8xf32>, vector<2x8x8xf32>, vector<2x8x8xf32> -> vector<2x8x8xf32>
    "tpu.trace_stop"() : () -> ()
    %49 = vector.shape_cast %48 : vector<2x8x8xf32> to vector<16x8xf32>
    %c0_17 = arith.constant 0 : index
    %c8 = arith.constant 8 : index
    %50 = vector.load %arg9[%c0_17, %c8] : memref<16x32xf32, #tpu.memory_space<vmem>>, vector<16x8xf32>
    tpu.vector_store %arg9[%c0_17, %c8], %49 {strides = array<i32>} : memref<16x32xf32, #tpu.memory_space<vmem>>, vector<16x8xf32>,
    %51 = vector.extract_strided_slice %12 {offsets = [0, 16], sizes = [16, 8], strides = [1, 1]} : vector<16x96xf32> to vector<16x8xf32>
    %52 = vector.shape_cast %51 : vector<16x8xf32> to vector<2x8x8xf32>
    %53 = vector.extract_strided_slice %12 {offsets = [0, 48], sizes = [16, 8], strides = [1, 1]} : vector<16x96xf32> to vector<16x8xf32>
    %54 = vector.shape_cast %53 : vector<16x8xf32> to vector<2x8x8xf32>
    %55 = vector.extract_strided_slice %12 {offsets = [0, 80], sizes = [16, 8], strides = [1, 1]} : vector<16x96xf32> to vector<16x8xf32>
    %56 = vector.shape_cast %55 : vector<16x8xf32> to vector<2x8x8xf32>
    "tpu.trace_start"() <{level = 10 : i32, message = "bqd,bkd->bqk"}> : () -> ()
    %cst_18 = arith.constant dense<0.000000e+00> : vector<2x8x8xf32>
    %57 = tpu.matmul %52, %54, %cst_18 {dimension_numbers = #tpu.dot_dimension_numbers<[2], [2], [1], [1], [0, 0, 0, 1, 1, 1], [0], [0]>} : vector<2x8x8xf32>, vector<2x8x8xf32>, vector<2x8x8xf32> -> vector<2x8x8xf32>
    "tpu.trace_stop"() : () -> ()
    %cst_19 = arith.constant dense<0xFF800000> : vector<2x8xf32>
    %58 = vector.multi_reduction <maximumf>, %57, %cst_19 [2] : vector<2x8x8xf32> to vector<2x8xf32>
    %59 = vector.shape_cast %58 : vector<2x8xf32> to vector<2x8x1xf32>
    %60 = vector.broadcast %59 : vector<2x8x1xf32> to vector<2x8x8xf32>
    %61 = arith.subf %57, %60 : vector<2x8x8xf32>
    %62 = math.exp %61 : vector<2x8x8xf32>
    %cst_20 = arith.constant dense<0.000000e+00> : vector<2x8xf32>
    %63 = vector.multi_reduction <add>, %62, %cst_20 [2] : vector<2x8x8xf32> to vector<2x8xf32>
    %64 = vector.shape_cast %63 : vector<2x8xf32> to vector<2x8x1xf32>
    %65 = vector.broadcast %64 : vector<2x8x1xf32> to vector<2x8x8xf32>
    %66 = arith.divf %62, %65 : vector<2x8x8xf32>
    "tpu.trace_start"() <{level = 10 : i32, message = "bqk,bkd->bqd"}> : () -> ()
    %cst_21 = arith.constant dense<0.000000e+00> : vector<2x8x8xf32>
    %67 = tpu.matmul %66, %56, %cst_21 {dimension_numbers = #tpu.dot_dimension_numbers<[2], [1], [1], [2], [0, 0, 0, 1, 1, 2], [0], [0]>} : vector<2x8x8xf32>, vector<2x8x8xf32>, vector<2x8x8xf32> -> vector<2x8x8xf32>
    "tpu.trace_stop"() : () -> ()
    %68 = vector.shape_cast %67 : vector<2x8x8xf32> to vector<16x8xf32>
    %c0_22 = arith.constant 0 : index
    %c16 = arith.constant 16 : index
    %69 = vector.load %arg9[%c0_22, %c16] : memref<16x32xf32, #tpu.memory_space<vmem>>, vector<16x8xf32>
    tpu.vector_store %arg9[%c0_22, %c16], %68 {strides = array<i32>} : memref<16x32xf32, #tpu.memory_space<vmem>>, vector<16x8xf32>,
    %70 = vector.extract_strided_slice %12 {offsets = [0, 24], sizes = [16, 8], strides = [1, 1]} : vector<16x96xf32> to vector<16x8xf32>
    %71 = vector.shape_cast %70 : vector<16x8xf32> to vector<2x8x8xf32>
    %72 = vector.extract_strided_slice %12 {offsets = [0, 56], sizes = [16, 8], strides = [1, 1]} : vector<16x96xf32> to vector<16x8xf32>
    %73 = vector.shape_cast %72 : vector<16x8xf32> to vector<2x8x8xf32>
    %74 = vector.extract_strided_slice %12 {offsets = [0, 88], sizes = [16, 8], strides = [1, 1]} : vector<16x96xf32> to vector<16x8xf32>
    %75 = vector.shape_cast %74 : vector<16x8xf32> to vector<2x8x8xf32>
    "tpu.trace_start"() <{level = 10 : i32, message = "bqd,bkd->bqk"}> : () -> ()
    %cst_23 = arith.constant dense<0.000000e+00> : vector<2x8x8xf32>
    %76 = tpu.matmul %71, %73, %cst_23 {dimension_numbers = #tpu.dot_dimension_numbers<[2], [2], [1], [1], [0, 0, 0, 1, 1, 1], [0], [0]>} : vector<2x8x8xf32>, vector<2x8x8xf32>, vector<2x8x8xf32> -> vector<2x8x8xf32>
    "tpu.trace_stop"() : () -> ()
    %cst_24 = arith.constant dense<0xFF800000> : vector<2x8xf32>
    %77 = vector.multi_reduction <maximumf>, %76, %cst_24 [2] : vector<2x8x8xf32> to vector<2x8xf32>
    %78 = vector.shape_cast %77 : vector<2x8xf32> to vector<2x8x1xf32>
    %79 = vector.broadcast %78 : vector<2x8x1xf32> to vector<2x8x8xf32>
    %80 = arith.subf %76, %79 : vector<2x8x8xf32>
    %81 = math.exp %80 : vector<2x8x8xf32>
    %cst_25 = arith.constant dense<0.000000e+00> : vector<2x8xf32>
    %82 = vector.multi_reduction <add>, %81, %cst_25 [2] : vector<2x8x8xf32> to vector<2x8xf32>
    %83 = vector.shape_cast %82 : vector<2x8xf32> to vector<2x8x1xf32>
    %84 = vector.broadcast %83 : vector<2x8x1xf32> to vector<2x8x8xf32>
    %85 = arith.divf %81, %84 : vector<2x8x8xf32>
    "tpu.trace_start"() <{level = 10 : i32, message = "bqk,bkd->bqd"}> : () -> ()
    %cst_26 = arith.constant dense<0.000000e+00> : vector<2x8x8xf32>
    %86 = tpu.matmul %85, %75, %cst_26 {dimension_numbers = #tpu.dot_dimension_numbers<[2], [1], [1], [2], [0, 0, 0, 1, 1, 2], [0], [0]>} : vector<2x8x8xf32>, vector<2x8x8xf32>, vector<2x8x8xf32> -> vector<2x8x8xf32>
    "tpu.trace_stop"() : () -> ()
    %87 = vector.shape_cast %86 : vector<2x8x8xf32> to vector<16x8xf32>
    %c0_27 = arith.constant 0 : index
    %c24 = arith.constant 24 : index
    %88 = vector.load %arg9[%c0_27, %c24] : memref<16x32xf32, #tpu.memory_space<vmem>>, vector<16x8xf32>
    tpu.vector_store %arg9[%c0_27, %c24], %87 {strides = array<i32>} : memref<16x32xf32, #tpu.memory_space<vmem>>, vector<16x8xf32>,
    %c0_28 = arith.constant 0 : index
    %c0_29 = arith.constant 0 : index
    %89 = vector.load %arg9[%c0_28, %c0_29] : memref<16x32xf32, #tpu.memory_space<vmem>>, vector<16x32xf32>
    %c0_30 = arith.constant 0 : index
    %c0_31 = arith.constant 0 : index
    %90 = vector.load %arg3[%c0_30, %c0_31] : memref<32x32xf32, #tpu.memory_space<vmem>>, vector<32x32xf32>
    %cst_32 = arith.constant dense<0.000000e+00> : vector<16x32xf32>
    %91 = tpu.matmul %89, %90, %cst_32 {dimension_numbers = #tpu.dot_dimension_numbers<[1], [0], [0], [1], [0, 0, 1, 1], [], []>} : vector<16x32xf32>, vector<32x32xf32>, vector<16x32xf32> -> vector<16x32xf32>
    %92 = vector.broadcast %2 : vector<1x32xf32> to vector<16x32xf32>
    %93 = arith.addf %91, %92 : vector<16x32xf32>
    %94 = arith.addf %0, %93 : vector<16x32xf32>
    %cst_33 = arith.constant dense<0.000000e+00> : vector<16xf32>
    %95 = vector.multi_reduction <add>, %94, %cst_33 [1] : vector<16x32xf32> to vector<16xf32>
    %96 = vector.shape_cast %95 : vector<16xf32> to vector<16x1xf32>
    %cst_34 = arith.constant 3.200000e+01 : f32
    %97 = vector.broadcast %cst_34 : f32 to vector<16x1xf32>
    %98 = arith.divf %96, %97 : vector<16x1xf32>
    %99 = vector.broadcast %98 : vector<16x1xf32> to vector<16x32xf32>
    %100 = arith.subf %94, %99 : vector<16x32xf32>
    %101 = arith.mulf %100, %100 : vector<16x32xf32>
    %cst_35 = arith.constant dense<0.000000e+00> : vector<16xf32>
    %102 = vector.multi_reduction <add>, %101, %cst_35 [1] : vector<16x32xf32> to vector<16xf32>
    %103 = vector.shape_cast %102 : vector<16xf32> to vector<16x1xf32>
    %cst_36 = arith.constant 3.200000e+01 : f32
    %104 = vector.broadcast %cst_36 : f32 to vector<16x1xf32>
    %105 = arith.divf %103, %104 : vector<16x1xf32>
    %106 = vector.broadcast %98 : vector<16x1xf32> to vector<16x32xf32>
    %107 = arith.subf %94, %106 : vector<16x32xf32>
    %cst_37 = arith.constant 9.99999974E-6 : f32
    %108 = vector.broadcast %cst_37 : f32 to vector<16x1xf32>
    %109 = arith.addf %105, %108 : vector<16x1xf32>
    %110 = math.rsqrt %109 : vector<16x1xf32>
    %111 = vector.broadcast %110 : vector<16x1xf32> to vector<16x32xf32>
    %112 = arith.mulf %107, %111 : vector<16x32xf32>
    %113 = vector.broadcast %3 : vector<1x32xf32> to vector<16x32xf32>
    %114 = arith.mulf %112, %113 : vector<16x32xf32>
    %115 = vector.broadcast %4 : vector<1x32xf32> to vector<16x32xf32>
    %116 = arith.addf %114, %115 : vector<16x32xf32>
    %c0_38 = arith.constant 0 : index
    %c0_39 = arith.constant 0 : index
    %117 = vector.load %arg4[%c0_38, %c0_39] : memref<32x64xf32, #tpu.memory_space<vmem>>, vector<32x64xf32>
    %cst_40 = arith.constant dense<0.000000e+00> : vector<16x64xf32>
    %118 = tpu.matmul %116, %117, %cst_40 {dimension_numbers = #tpu.dot_dimension_numbers<[1], [0], [0], [1], [0, 0, 1, 1], [], []>} : vector<16x32xf32>, vector<32x64xf32>, vector<16x64xf32> -> vector<16x64xf32>
    %c0_41 = arith.constant 0 : index
    %c0_42 = arith.constant 0 : index
    %119 = vector.load %arg5[%c0_41, %c0_42] : memref<1x64xf32, #tpu.memory_space<vmem>>, vector<1x64xf32>
    %120 = vector.broadcast %119 : vector<1x64xf32> to vector<16x64xf32>
    %121 = arith.addf %118, %120 : vector<16x64xf32>
    %cst_43 = arith.constant 0.000000e+00 : f32
    %122 = vector.broadcast %cst_43 : f32 to vector<16x64xf32>
    %123 = arith.maximumf %121, %122 : vector<16x64xf32>
    %c0_44 = arith.constant 0 : index
    %c0_45 = arith.constant 0 : index
    %124 = vector.load %arg6[%c0_44, %c0_45] : memref<64x32xf32, #tpu.memory_space<vmem>>, vector<64x32xf32>
    %cst_46 = arith.constant dense<0.000000e+00> : vector<16x32xf32>
    %125 = tpu.matmul %123, %124, %cst_46 {dimension_numbers = #tpu.dot_dimension_numbers<[1], [0], [0], [1], [0, 0, 1, 1], [], []>} : vector<16x64xf32>, vector<64x32xf32>, vector<16x32xf32> -> vector<16x32xf32>
    %126 = vector.broadcast %5 : vector<1x32xf32> to vector<16x32xf32>
    %127 = arith.addf %125, %126 : vector<16x32xf32>
    %128 = arith.addf %116, %127 : vector<16x32xf32>
    %cst_47 = arith.constant dense<0.000000e+00> : vector<16xf32>
    %129 = vector.multi_reduction <add>, %128, %cst_47 [1] : vector<16x32xf32> to vector<16xf32>
    %130 = vector.shape_cast %129 : vector<16xf32> to vector<16x1xf32>
    %cst_48 = arith.constant 3.200000e+01 : f32
    %131 = vector.broadcast %cst_48 : f32 to vector<16x1xf32>
    %132 = arith.divf %130, %131 : vector<16x1xf32>
    %133 = vector.broadcast %132 : vector<16x1xf32> to vector<16x32xf32>
    %134 = arith.subf %128, %133 : vector<16x32xf32>
    %135 = arith.mulf %134, %134 : vector<16x32xf32>
    %cst_49 = arith.constant dense<0.000000e+00> : vector<16xf32>
    %136 = vector.multi_reduction <add>, %135, %cst_49 [1] : vector<16x32xf32> to vector<16xf32>
    %137 = vector.shape_cast %136 : vector<16xf32> to vector<16x1xf32>
    %cst_50 = arith.constant 3.200000e+01 : f32
    %138 = vector.broadcast %cst_50 : f32 to vector<16x1xf32>
    %139 = arith.divf %137, %138 : vector<16x1xf32>
    %140 = vector.broadcast %132 : vector<16x1xf32> to vector<16x32xf32>
    %141 = arith.subf %128, %140 : vector<16x32xf32>
    %cst_51 = arith.constant 9.99999974E-6 : f32
    %142 = vector.broadcast %cst_51 : f32 to vector<16x1xf32>
    %143 = arith.addf %139, %142 : vector<16x1xf32>
    %144 = math.rsqrt %143 : vector<16x1xf32>
    %145 = vector.broadcast %144 : vector<16x1xf32> to vector<16x32xf32>
    %146 = arith.mulf %141, %145 : vector<16x32xf32>
    %147 = vector.broadcast %6 : vector<1x32xf32> to vector<16x32xf32>
    %148 = arith.mulf %146, %147 : vector<16x32xf32>
    %149 = vector.broadcast %7 : vector<1x32xf32> to vector<16x32xf32>
    %150 = arith.addf %148, %149 : vector<16x32xf32>
    %c0_52 = arith.constant 0 : index
    %c0_53 = arith.constant 0 : index
    %151 = vector.load %arg8[%c0_52, %c0_53] : memref<16x32xf32, #tpu.memory_space<vmem>>, vector<16x32xf32>
    tpu.vector_store %arg8[%c0_52, %c0_53], %150 {strides = array<i32>} : memref<16x32xf32, #tpu.memory_space<vmem>>, vector<16x32xf32>,
    return
  }
}

</mosaic_0001>

<bundles_post_ra>
// kernel: encode_layer.1
= control target key start
LH: loop header
LB: loop body
LE: loop exit
PB: predicated region body
PF: predicated region fallthrough
CT: control target
= control target key end

     0   :  { %13 = vsyncpa [#allocation4], 0  ;;  %s2515_s0 = inlined_call_operand.hbm [shape: f32[16,32], index: 0, kind: input, shape index: {}]   ;;  %s2516_s1 = inlined_call_operand.vmem [shape: f32[32,96], index: 1, kind: input, shape index: {}]   ;;  %s2517_s2 = inlined_call_operand.vmem [shape: f32[1,96], index: 2, kind: input, shape index: {}]   ;;  %s2518_s3 = inlined_call_operand.vmem [shape: f32[32,32], index: 3, kind: input, shape index: {}]   ;;  %s2519_s4 = inlined_call_operand.vmem [shape: f32[32,64], index: 4, kind: input, shape index: {}]   ;;  %s2520_s5 = inlined_call_operand.vmem [shape: f32[1,64], index: 5, kind: input, shape index: {}]   ;;  %s2521_s6 = inlined_call_operand.vmem [shape: f32[64,32], index: 6, kind: input, shape index: {}]   ;;  %s2522_s7 = inlined_call_operand.vmem [shape: f32[6,32], index: 7, kind: input, shape index: {}]   ;;  %s2523_s8 = inlined_call_operand.hbm [shape: f32[16,32], index: 8, kind: output, shape index: {}]  }
   0x1   :  { %14 = vsyncpa [#allocation5], 0  ;;  %s2202_s27 = smov [#allocation3]  }
   0x2   :  { %s20_s28 = sshll.u32 %s2202_s27, 4  ;;  %s21_s28 = int_to_ptr.vmem [resolvable:$true] %s20_s28 }
   0x3   :  { %s2166_s29 = scalar_lea.vmem %s21_s28, 256  ;;  %p2171_p1 = scmp.lt.s32.totalorder %s21_s28, %s21_s28 }
   0x4   :  { %p2167_p0 = scmp.ne.s32.totalorder %s21_s28, %s2166_s29  ;;  %p2172_p2 = scmp.lt.s32.totalorder %s2166_s29, %s2166_s29 }
   0x6   :  { %p2173_p3 = por %p2172_p2, %p2171_p1 }
   0x8   :  { %p2174_p4 = pnand %p2173_p3, %p2167_p0 }
   0xa   :  { %2177 = shalt.err (!%p2174_p4)
}
   0xb   :  { %s2203_s30 = smov 128   ;;  %s2204_s9 = smov 8  }
   0xc   :  { %26 = dma.hbm_to_vmem [thread:$0]  %s2515_s0, 256, %s21_s28, [#allocation4], %s2203_s30, %s2203_s30, %s2204_s9  }
   0xd   :  { %2198 = dma.done.wait [#allocation4], 256  }
   0xe   :  { %2199 = vsyncadd [#allocation4], 4294967040  ;;  %vm58_vm0 = vcmask 261120   ;;  %v50_v0 = vld [vmem:[%s2516_s1 + $0x18] sm:$0xff]  ;;  %v49_v1 = vld [vmem:[%s2516_s1 + $0x10] sm:$0xff]  ;;  %v2205_v6 = vmov 0.0  }
   0xf   :  { %1967 = vmatprep.subr.mxu1 %v50_v0  ;;  %v2278_v2 = vld [vmem:[#allocation3] sm:$0xff]  ;;  %v48_v3 = vld [vmem:[%s2516_s1 + $0x8] sm:$0xff]  ;;  %v47_v4 = vld [vmem:[%s2516_s1] sm:$0xff]  ;;  %1988 = vmatprep.subr.mxu0 %v2205_v6  ;;  %vm2206_vm1 = vmmov 0   ;;  %s2207_s20 = smov 96   ;;  %vm143_vm2 = vcmask 64512  }
  0x10   :  { %1968 = vmatpush3.msra.mxu1 %v50_v0  ;;  %1975 = vmatprep.mubr.msk.f32.mxu1 %vm58_vm0, %v2278_v2  ;;  %v2288_v5 = vld [vmem:[#allocation3 + $0x8] sm:$0xff]  ;;  %v1873_v8 = vld [vmem:[%s2517_s2] ss:$0 sm:$0xff]  ;;  %s2208_s2 = smov 64   ;;  %s2209_s21 = smov 88   ;;  %vm809_vm3 = vcmask 130112  }
  0x11   :  { %1969 = vmatprep.subr.mxu1 %v49_v1  ;;  %1990 = vmatprep.mubr.msk.f32.mxu0 %vm2206_vm1, %v2205_v6  ;;  %s2210_s22 = smov 120   ;;  %s2211_s23 = smov 56   ;;  %vm1150_vm4 = vcmask 195712   ;;  %vm1491_vm5 = vcmask 261312   ;;  %vm1732_vm6 = vcmask 523264  }
  0x12   :  { %1970 = vmatpush3.msra.mxu1 %v49_v1  ;;  %s2212_s24 = smov 80   ;;  %s2213_s25 = smov 112  }
  0x13   :  { %1971 = vmatprep.subr.mxu1 %v48_v3  ;;  %s2214_s26 = smov 48   ;;  %s2215_s27 = smov 72  }
  0x14   :  { %1972 = vmatpush3.msra.mxu1 %v48_v3  ;;  %s2216_s28 = smov 104   ;;  %s2217_s29 = smov 40  }
  0x15   :  { %1973 = vmatprep.subr.mxu1 %v47_v4  ;;  %s2218_s10 = smov 16   ;;  %s2219_s18 = smov 24  }
  0x16   :  { %1974 = vmatpush3.msra.mxu1 %v47_v4 }
  0x17   :  { %1976 = vmatmul.mubr.msk.f32.vlgmr.msra.gmra.mxu1 %vm58_vm0, %v2288_v5  ;;  %1978 = vmatprep.subr.mxu1 %v2205_v6 }
  0x18   :  { %1980 = vmatprep.mubr.msk.f32.mxu1 %vm2206_vm1, %v2205_v6 }
  0xd7   :  { %v1977_v7 = vpop.f32.mrf.mxu1 }
  0xd8   :  { %v2304_v11 = vadd.f32 %v1977_v7, %v1873_v8 }
  0xd9   :  { %v131_v9 = vpop.f32.mrf.mxu1 }
  0xda   :  { %v2301_v10 = vadd.f32 %v1873_v8, %v131_v9 }
  0xdc   :  { %141 = vrot.lane.b32.xlu0 %v2301_v10, %s2207_s20 }
  0xe0   :  { %219 = vrot.lane.b32.xlu0 %v2304_v11, %s2207_s20 }
 0x14e   :  { %v142_v12 = vpop.permute.xlu0 %141 }
 0x14f   :  { %1979 = vmatpush3.xpose.msk.msra.mxu1 %vm143_vm2, %v142_v12 }
 0x150   :  { %1983 = vmatprep.subr.mxu1 %v2205_v6 }
 0x152   :  { %1981 = vmatmul.mubr.msk.f32.vlgmr.msra.gmra.mxu1 %vm143_vm2, %v2301_v10  ;;  %v220_v13 = vpop.permute.xlu0 %219 }
 0x153   :  { %1984 = vmatpush3.xpose.msk.msra.mxu1 %vm143_vm2, %v220_v13  ;;  %1985 = vmatprep.mubr.msk.f32.mxu1 %vm2206_vm1, %v2205_v6 }
 0x154   :  { %1993 = vmatprep.subr.mxu1 %v2205_v6 }
 0x156   :  { %1986 = vmatmul.mubr.msk.f32.vlgmr.msra.gmra.mxu1 %vm143_vm2, %v2304_v11 }
 0x157   :  { %1995 = vmatprep.mubr.msk.f32.mxu1 %vm2206_vm1, %v2205_v6 }
 0x212   :  { %v214_v14 = vpop.f32.mrf.mxu1 }
 0x213   :  { %v295_v15 = vsel %vm143_vm2, %v214_v14, -inf }
 0x214   :  { %296 = vmax.xlane.f32.xlu1 %v295_v15  ;;  %v1982_v16 = vpop.f32.mrf.mxu1 }
 0x216   :  { %v291_v17 = vpop.f32.mrf.mxu1 }
 0x217   :  { %v298_v18 = vsel %vm143_vm2, %v291_v17, -inf }
 0x218   :  { %299 = vmax.xlane.f32.xlu1 %v298_v18  ;;  %v1987_v19 = vpop.f32.mrf.mxu1 }
 0x229   :  { %317 = vrot.lane.b32.xlu1 %v2301_v10, %s2208_s2 }
 0x22d   :  { %393 = vrot.lane.b32.xlu1 %v2304_v11, %s2208_s2 }
 0x231   :  { %473 = vrot.lane.b32.xlu1 %v2301_v10, %s2209_s21 }
 0x235   :  { %551 = vrot.lane.b32.xlu1 %v2304_v11, %s2209_s21 }
 0x29d   :  { %v297_v20 = vpop.xlane.xlu1 %296 }
 0x29e   :  { %v301_v21 = vsub.f32 %v214_v14, %v297_v20 }
 0x2a0   :  { %v303_v22 = vmul.f32 1.442695, %v301_v21 }
 0x2a1   :  { %v300_v23 = vpop.xlane.xlu1 %299 }
 0x2a2   :  { %2118 = vpow2.f32 %v303_v22  ;;  %v302_v24 = vsub.f32 %v291_v17, %v300_v23 }
 0x2a4   :  { %v305_v25 = vmul.f32 1.442695, %v302_v24 }
 0x2a5   :  { %v318_v26 = vpop.permute.xlu1 %317 }
 0x2a6   :  { %2120 = vpow2.f32 %v305_v25  ;;  %1989 = vmatpush3.msra.mxu0 %v318_v26 }
 0x2a7   :  { %1998 = vmatprep.subr.mxu0 %v2205_v6 }
 0x2a9   :  { %v394_v27 = vpop.permute.xlu1 %393 }
 0x2aa   :  { %1994 = vmatpush3.msra.mxu1 %v394_v27 }
 0x2ab   :  { %2003 = vmatprep.subr.mxu1 %v2205_v6 }
 0x2ad   :  { %v474_v32 = vpop.permute.xlu1 %473 }
 0x2af   :  { %v2119_v28 = vpop.eup %2118 }
 0x2b0   :  { %v307_v29 = vsel %vm143_vm2, %v2119_v28, 0.0 }
 0x2b1   :  { %308 = vadd.xlane.f32.xlu0 %v307_v29  ;;  %v552_v33 = vpop.permute.xlu1 %551 }
 0x2b3   :  { %v2121_v30 = vpop.eup %2120 }
 0x2b4   :  { %v310_v31 = vsel %vm143_vm2, %v2121_v30, 0.0 }
 0x2b5   :  { %311 = vadd.xlane.f32.xlu1 %v310_v31 }
 0x2c6   :  { %549 = vrot.lane.b32.xlu1 %v2304_v11, %s2210_s22 }
 0x2c7   :  { %471 = vrot.lane.b32.xlu0 %v2301_v10, %s2210_s22 }
 0x33a   :  { %v309_v34 = vpop.xlane.xlu0 %308 }
 0x33b   :  { %2122 = vrcp.f32 %v309_v34 }
 0x33e   :  { %v312_v35 = vpop.xlane.xlu1 %311  ;;  %v472_v40 = vpop.permute.xlu0 %471 }
 0x33f   :  { %2124 = vrcp.f32 %v312_v35 }
 0x342   :  { %v550_v41 = vpop.permute.xlu1 %549 }
 0x348   :  { %v2123_v36 = vpop.eup %2122 }
 0x349   :  { %v314_v37 = vmul.f32 %v2123_v36, %v2119_v28 }
 0x34b   :  { %1991 = vmatmul.mubr.msk.f32.vlgmr.msra.gmra.mxu0 %vm143_vm2, %v314_v37 }
 0x34c   :  { %v2125_v38 = vpop.eup %2124  ;;  %1999 = vmatpush3.xpose.msk.msra.mxu0 %vm143_vm2, %v474_v32  ;;  %2000 = vmatprep.mubr.msk.f32.mxu0 %vm2206_vm1, %v2205_v6 }
 0x34d   :  { %v316_v39 = vmul.f32 %v2125_v38, %v2121_v30  ;;  %2008 = vmatprep.subr.mxu0 %v2205_v6 }
 0x34f   :  { %1996 = vmatmul.mubr.msk.f32.vlgmr.msra.gmra.mxu1 %vm143_vm2, %v316_v39  ;;  %2001 = vmatmul.mubr.msk.f32.vlgmr.msra.gmra.mxu0 %vm143_vm2, %v472_v40 }
 0x350   :  { %2004 = vmatpush3.xpose.msk.msra.mxu1 %vm143_vm2, %v552_v33  ;;  %2005 = vmatprep.mubr.msk.f32.mxu1 %vm2206_vm1, %v2205_v6 }
 0x351   :  { %2013 = vmatprep.subr.mxu1 %v2205_v6  ;;  %2010 = vmatprep.mubr.msk.f32.mxu0 %vm2206_vm1, %v2205_v6 }
 0x353   :  { %2006 = vmatmul.mubr.msk.f32.vlgmr.msra.gmra.mxu1 %vm143_vm2, %v550_v41 }
 0x354   :  { %2015 = vmatprep.mubr.msk.f32.mxu1 %vm2206_vm1, %v2205_v6 }
 0x40b   :  { %v389_v42 = vpop.f32.mrf.mxu0 }
 0x40c   :  { %469 = vst.msk [vmem:[#allocation2] sm:$0xff] %vm143_vm2, %v389_v42 }
 0x40d   :  { %v1992_v43 = vpop.f32.mrf.mxu0 }
 0x40f   :  { %v465_v44 = vpop.f32.mrf.mxu1  ;;  %v545_v45 = vpop.f32.mrf.mxu0 }
 0x410   :  { %470 = vst.msk [vmem:[#allocation2 + $0x8] sm:$0xff] %vm143_vm2, %v465_v44  ;;  %v627_v46 = vsel %vm143_vm2, %v545_v45, -inf }
 0x411   :  { %v1997_v47 = vpop.f32.mrf.mxu1  ;;  %628 = vmax.xlane.f32.xlu1 %v627_v46  ;;  %v2002_v48 = vpop.f32.mrf.mxu0 }
 0x413   :  { %v623_v49 = vpop.f32.mrf.mxu1 }
 0x414   :  { %v630_v50 = vsel %vm143_vm2, %v623_v49, -inf }
 0x415   :  { %631 = vmax.xlane.f32.xlu0 %v630_v50  ;;  %v2007_v51 = vpop.f32.mrf.mxu1 }
 0x422   :  { %649 = vrot.lane.b32.xlu1 %v2301_v10, %s2211_s23 }
 0x426   :  { %814 = vrot.lane.b32.xlu1 %v2301_v10, %s2212_s24 }
 0x42a   :  { %892 = vrot.lane.b32.xlu1 %v2304_v11, %s2212_s24 }
 0x42b   :  { %725 = vrot.lane.b32.xlu0 %v2304_v11, %s2211_s23 }
 0x42f   :  { %812 = vrot.lane.b32.xlu0 %v2301_v10, %s2213_s25 }
 0x49a   :  { %v629_v52 = vpop.xlane.xlu1 %628 }
 0x49b   :  { %v633_v53 = vsub.f32 %v545_v45, %v629_v52 }
 0x49d   :  { %v635_v54 = vmul.f32 1.442695, %v633_v53 }
 0x49e   :  { %v650_v55 = vpop.permute.xlu1 %649  ;;  %v632_v56 = vpop.xlane.xlu0 %631 }
 0x49f   :  { %2126 = vpow2.f32 %v635_v54  ;;  %v634_v57 = vsub.f32 %v623_v49, %v632_v56  ;;  %2009 = vmatpush3.msra.mxu0 %v650_v55 }
 0x4a0   :  { %2018 = vmatprep.subr.mxu0 %v2205_v6 }
 0x4a1   :  { %v637_v58 = vmul.f32 1.442695, %v634_v57 }
 0x4a2   :  { %v726_v59 = vpop.permute.xlu0 %725  ;;  %v815_v0 = vpop.permute.xlu1 %814 }
 0x4a3   :  { %2128 = vpow2.f32 %v637_v58  ;;  %2014 = vmatpush3.msra.mxu1 %v726_v59 }
 0x4a4   :  { %2023 = vmatprep.subr.mxu1 %v2205_v6 }
 0x4a6   :  { %v893_v1 = vpop.permute.xlu1 %892  ;;  %v813_v13 = vpop.permute.xlu0 %812 }
 0x4ac   :  { %v2127_v60 = vpop.eup %2126 }
 0x4ad   :  { %v639_v61 = vsel %vm143_vm2, %v2127_v60, 0.0 }
 0x4ae   :  { %640 = vadd.xlane.f32.xlu1 %v639_v61 }
 0x4b0   :  { %v2129_v62 = vpop.eup %2128 }
 0x4b1   :  { %v642_v63 = vsel %vm143_vm2, %v2129_v62, 0.0 }
 0x4b2   :  { %643 = vadd.xlane.f32.xlu1 %v642_v63 }
 0x4c3   :  { %890 = vrot.lane.b32.xlu1 %v2304_v11, %s2213_s25 }
 0x537   :  { %v641_v3 = vpop.xlane.xlu1 %640 }
 0x538   :  { %2130 = vrcp.f32 %v641_v3 }
 0x53b   :  { %v644_v4 = vpop.xlane.xlu1 %643 }
 0x53c   :  { %2132 = vrcp.f32 %v644_v4 }
 0x53f   :  { %v891_v14 = vpop.permute.xlu1 %890 }
 0x545   :  { %v2131_v7 = vpop.eup %2130 }
 0x546   :  { %v646_v8 = vmul.f32 %v2131_v7, %v2127_v60 }
 0x548   :  { %2011 = vmatmul.mubr.msk.f32.vlgmr.msra.gmra.mxu0 %vm143_vm2, %v646_v8 }
 0x549   :  { %v2133_v9 = vpop.eup %2132  ;;  %2019 = vmatpush3.xpose.msk.msra.mxu0 %vm143_vm2, %v815_v0  ;;  %2020 = vmatprep.mubr.msk.f32.mxu0 %vm2206_vm1, %v2205_v6 }
 0x54a   :  { %v648_v12 = vmul.f32 %v2133_v9, %v2129_v62  ;;  %2028 = vmatprep.subr.mxu0 %v2205_v6 }
 0x54c   :  { %2016 = vmatmul.mubr.msk.f32.vlgmr.msra.gmra.mxu1 %vm143_vm2, %v648_v12  ;;  %2021 = vmatmul.mubr.msk.f32.vlgmr.msra.gmra.mxu0 %vm143_vm2, %v813_v13 }
 0x54d   :  { %2024 = vmatpush3.xpose.msk.msra.mxu1 %vm143_vm2, %v893_v1  ;;  %2025 = vmatprep.mubr.msk.f32.mxu1 %vm2206_vm1, %v2205_v6 }
 0x54e   :  { %2033 = vmatprep.subr.mxu1 %v2205_v6  ;;  %2030 = vmatprep.mubr.msk.f32.mxu0 %vm2206_vm1, %v2205_v6 }
 0x550   :  { %2026 = vmatmul.mubr.msk.f32.vlgmr.msra.gmra.mxu1 %vm143_vm2, %v891_v14 }
 0x551   :  { %2035 = vmatprep.mubr.msk.f32.mxu1 %vm2206_vm1, %v2205_v6 }
 0x608   :  { %v2377_v15 = vpop.f32.mrf.mxu0 }
 0x60a   :  { %v2012_v16 = vpop.f32.mrf.mxu0 }
 0x60c   :  { %v2379_v17 = vpop.f32.mrf.mxu1  ;;  %v886_v18 = vpop.f32.mrf.mxu0 }
 0x60d   :  { %v968_v19 = vsel %vm143_vm2, %v886_v18, -inf }
 0x60e   :  { %v2017_v20 = vpop.f32.mrf.mxu1  ;;  %969 = vmax.xlane.f32.xlu0 %v968_v19  ;;  %v2022_v21 = vpop.f32.mrf.mxu0  ;;  %v1497_v19 = vld [vmem:[%s2518_s3 + $0x8] sm:$0xff] }
 0x60f   :  { %v1496_v20 = vld [vmem:[%s2518_s3] sm:$0xff] }
 0x610   :  { %v964_v22 = vpop.f32.mrf.mxu1 }
 0x611   :  { %v971_v23 = vsel %vm143_vm2, %v964_v22, -inf }
 0x612   :  { %972 = vmax.xlane.f32.xlu1 %v971_v23  ;;  %v2027_v24 = vpop.f32.mrf.mxu1 }
 0x623   :  { %990 = vrot.lane.b32.xlu1 %v2301_v10, %s2214_s26 }
 0x624   :  { %1066 = vrot.lane.b32.xlu0 %v2304_v11, %s2214_s26 }
 0x627   :  { %1155 = vrot.lane.b32.xlu1 %v2301_v10, %s2215_s27 }
 0x62b   :  { %1233 = vrot.lane.b32.xlu1 %v2304_v11, %s2215_s27 }
 0x62f   :  { %1231 = vrot.lane.b32.xlu1 %v2304_v11, %s2216_s28 }
 0x697   :  { %v970_v25 = vpop.xlane.xlu0 %969 }
 0x698   :  { %v974_v26 = vsub.f32 %v886_v18, %v970_v25  ;;  %v1498_v18 = vld [vmem:[%s2518_s3 + $0x10] sm:$0xff] }
 0x69a   :  { %v976_v27 = vmul.f32 1.442695, %v974_v26 }
 0x69b   :  { %v973_v28 = vpop.xlane.xlu1 %972  ;;  %v1067_v29 = vpop.permute.xlu0 %1066 }
 0x69c   :  { %2134 = vpow2.f32 %v976_v27  ;;  %v975_v30 = vsub.f32 %v964_v22, %v973_v28  ;;  %2034 = vmatpush3.msra.mxu1 %v1067_v29  ;;  %v1500_v29 = vlaneseq }
 0x69d   :  { %2043 = vmatprep.subr.mxu1 %v2205_v6 }
 0x69e   :  { %v978_v31 = vmul.f32 1.442695, %v975_v30  ;;  %v2437_v30 = vshrl.u32 %v1500_v29, 7 }
 0x69f   :  { %v991_v32 = vpop.permute.xlu1 %990 }
 0x6a0   :  { %2136 = vpow2.f32 %v978_v31  ;;  %2029 = vmatpush3.msra.mxu0 %v991_v32  ;;  %v1502_v31 = vsub.s32 0, %v2437_v30  ;;  %v2443_v32 = vld [vmem:[%s2522_s7] sm:$0x3f] }
 0x6a1   :  { %2038 = vmatprep.subr.mxu0 %v2205_v6 }
 0x6a3   :  { %v1156_v39 = vpop.permute.xlu1 %1155 }
 0x6a7   :  { %v1234_v43 = vpop.permute.xlu1 %1233 }
 0x6a9   :  { %v2135_v33 = vpop.eup %2134 }
 0x6aa   :  { %v980_v34 = vsel %vm143_vm2, %v2135_v33, 0.0 }
 0x6ab   :  { %981 = vadd.xlane.f32.xlu0 %v980_v34  ;;  %v1232_v46 = vpop.permute.xlu1 %1231 }
 0x6ad   :  { %v2137_v35 = vpop.eup %2136 }
 0x6ae   :  { %v983_v36 = vsel %vm143_vm2, %v2137_v35, 0.0 }
 0x6af   :  { %984 = vadd.xlane.f32.xlu0 %v983_v36 }
 0x6c5   :  { %1153 = vrot.lane.b32.xlu0 %v2301_v10, %s2216_s28 }
 0x734   :  { %v982_v37 = vpop.xlane.xlu0 %981 }
 0x735   :  { %2138 = vrcp.f32 %v982_v37 }
 0x738   :  { %v985_v38 = vpop.xlane.xlu0 %984 }
 0x739   :  { %2140 = vrcp.f32 %v985_v38 }
 0x73c   :  { %v1154_v45 = vpop.permute.xlu0 %1153 }
 0x742   :  { %v2139_v40 = vpop.eup %2138 }
 0x743   :  { %v987_v41 = vmul.f32 %v2139_v40, %v2135_v33  ;;  %v1503_v33 = vrot.slane %v2443_v32, %v1502_v31 }
 0x745   :  { %2031 = vmatmul.mubr.msk.f32.vlgmr.msra.gmra.mxu0 %vm143_vm2, %v987_v41 }
 0x746   :  { %v2141_v42 = vpop.eup %2140  ;;  %2039 = vmatpush3.xpose.msk.msra.mxu0 %vm143_vm2, %v1156_v39  ;;  %2040 = vmatprep.mubr.msk.f32.mxu0 %vm2206_vm1, %v2205_v6 }
 0x747   :  { %v989_v44 = vmul.f32 %v2141_v42, %v2137_v35  ;;  %2048 = vmatprep.subr.mxu0 %v2205_v6 }
 0x749   :  { %2036 = vmatmul.mubr.msk.f32.vlgmr.msra.gmra.mxu1 %vm143_vm2, %v989_v44  ;;  %2041 = vmatmul.mubr.msk.f32.vlgmr.msra.gmra.mxu0 %vm143_vm2, %v1154_v45 }
 0x74a   :  { %2044 = vmatpush3.xpose.msk.msra.mxu1 %vm143_vm2, %v1234_v43  ;;  %2045 = vmatprep.mubr.msk.f32.mxu1 %vm2206_vm1, %v2205_v6 }
 0x74b   :  { %2053 = vmatprep.subr.mxu1 %v2205_v6  ;;  %2050 = vmatprep.mubr.msk.f32.mxu0 %vm2206_vm1, %v2205_v6 }
 0x74d   :  { %2046 = vmatmul.mubr.msk.f32.vlgmr.msra.gmra.mxu1 %vm143_vm2, %v1232_v46 }
 0x74e   :  { %2055 = vmatprep.mubr.msk.f32.mxu1 %vm2206_vm1, %v2205_v6 }
 0x805   :  { %v1062_v47 = vpop.f32.mrf.mxu0 }
 0x807   :  { %v2032_v48 = vpop.f32.mrf.mxu0 }
 0x809   :  { %v1138_v49 = vpop.f32.mrf.mxu1  ;;  %v1227_v50 = vpop.f32.mrf.mxu0 }
 0x80a   :  { %v1309_v51 = vsel %vm143_vm2, %v1227_v50, -inf }
 0x80b   :  { %v2037_v52 = vpop.f32.mrf.mxu1  ;;  %1310 = vmax.xlane.f32.xlu0 %v1309_v51  ;;  %v2042_v53 = vpop.f32.mrf.mxu0  ;;  %v1628_v51 = vld [vmem:[%s2519_s4 + $0x10] sm:$0xff] }
 0x80c   :  { %v1627_v52 = vld [vmem:[%s2519_s4 + $0x8] sm:$0xff]  ;;  %v1626_v53 = vld [vmem:[%s2519_s4] sm:$0xff] }
 0x80d   :  { %v1305_v54 = vpop.f32.mrf.mxu1 }
 0x80e   :  { %v1312_v55 = vsel %vm143_vm2, %v1305_v54, -inf }
 0x80f   :  { %1313 = vmax.xlane.f32.xlu1 %v1312_v55  ;;  %v2047_v56 = vpop.f32.mrf.mxu1  ;;  %v1726_v55 = vld [vmem:[%s2521_s6 + $0x30] sm:$0xff] }
 0x810   :  { %v1725_v56 = vld [vmem:[%s2521_s6 + $0x28] sm:$0xff] }
 0x820   :  { %1331 = vrot.lane.b32.xlu1 %v2301_v10, %s2217_s29 }
 0x824   :  { %803 = vrot.lane.b32.xlu1 %v2377_v15, %s2204_s9 }
 0x828   :  { %805 = vrot.lane.b32.xlu1 %v2379_v17, %s2204_s9 }
 0x82c   :  { %1146 = vrot.lane.b32.xlu1 %v1138_v49, %s2218_s10 }
 0x894   :  { %v1311_v6 = vpop.xlane.xlu0 %1310 }
 0x895   :  { %v1315_v57 = vsub.f32 %v1227_v50, %v1311_v6  ;;  %v1724_v6 = vld [vmem:[%s2521_s6 + $0x20] sm:$0xff] }
 0x897   :  { %v1317_v58 = vmul.f32 1.442695, %v1315_v57 }
 0x898   :  { %v1314_v59 = vpop.xlane.xlu1 %1313 }
 0x899   :  { %2142 = vpow2.f32 %v1317_v58  ;;  %v1316_v60 = vsub.f32 %v1305_v54, %v1314_v59  ;;  %v1727_v54 = vld [vmem:[%s2521_s6 + $0x38] sm:$0xff] }
 0x89b   :  { %v1319_v61 = vmul.f32 1.442695, %v1316_v60 }
 0x89c   :  { %v1332_v62 = vpop.permute.xlu1 %1331 }
 0x89d   :  { %2144 = vpow2.f32 %v1319_v61  ;;  %2049 = vmatpush3.msra.mxu0 %v1332_v62 }
 0x8a0   :  { %v804_v10 = vpop.permute.xlu1 %803 }
 0x8a1   :  { %810 = vst.msk [vmem:[#allocation2] sm:$0xff] %vm809_vm3, %v804_v10  ;;  %v1616_v10 = vsub.s32 1, %v2437_v30 }
 0x8a4   :  { %v806_v63 = vpop.permute.xlu1 %805 }
 0x8a5   :  { %811 = vst.msk [vmem:[#allocation2 + $0x8] sm:$0xff] %vm809_vm3, %v806_v63  ;;  %v1622_v63 = vsub.s32 2, %v2437_v30 }
 0x8a6   :  { %v2143_v0 = vpop.eup %2142 }
 0x8a7   :  { %v1321_v1 = vsel %vm143_vm2, %v2143_v0, 0.0 }
 0x8a8   :  { %v1147_v3 = vpop.permute.xlu1 %1146  ;;  %1322 = vadd.xlane.f32.xlu0 %v1321_v1 }
 0x8a9   :  { %1152 = vst.msk [vmem:[#allocation2 + $0x8] sm:$0xff] %vm1150_vm4, %v1147_v3 }
 0x8aa   :  { %v2145_v4 = vpop.eup %2144 }
 0x8ab   :  { %v1324_v7 = vsel %vm143_vm2, %v2145_v4, 0.0 }
 0x8ac   :  { %1325 = vadd.xlane.f32.xlu0 %v1324_v7 }
 0x8c2   :  { %1407 = vrot.lane.b32.xlu0 %v2304_v11, %s2217_s29  ;;  %v1499_v11 = vld [vmem:[%s2518_s3 + $0x18] sm:$0xff] }
 0x8c3   :  { %2058 = vmatprep.subr.mxu0 %v1499_v11 }
 0x8c6   :  { %1144 = vrot.lane.b32.xlu0 %v1062_v47, %s2218_s10 }
 0x931   :  { %v1323_v8 = vpop.xlane.xlu0 %1322 }
 0x932   :  { %2146 = vrcp.f32 %v1323_v8 }
 0x935   :  { %v1326_v9 = vpop.xlane.xlu0 %1325 }
 0x936   :  { %2148 = vrcp.f32 %v1326_v9 }
 0x939   :  { %v1408_v12 = vpop.permute.xlu0 %1407 }
 0x93a   :  { %2054 = vmatpush3.msra.mxu1 %v1408_v12 }
 0x93d   :  { %v1145_v13 = vpop.permute.xlu0 %1144 }
 0x93e   :  { %1151 = vst.msk [vmem:[#allocation2] sm:$0xff] %vm1150_vm4, %v1145_v13 }
 0x93f   :  { %v2147_v14 = vpop.eup %2146 }
 0x940   :  { %v1328_v15 = vmul.f32 %v2147_v14, %v2143_v0  ;;  %v1617_v0 = vrot.slane %v2443_v32, %v1616_v10 }
 0x942   :  { %2051 = vmatmul.mubr.msk.f32.vlgmr.msra.gmra.mxu0 %vm143_vm2, %v1328_v15  ;;  %v1723_v15 = vld [vmem:[%s2521_s6 + $0x18] sm:$0xff] }
 0x943   :  { %v2149_v16 = vpop.eup %2148  ;;  %2059 = vmatpush3.msra.mxu0 %v1499_v11  ;;  %v1720_v11 = vld [vmem:[%s2521_s6] sm:$0xff] }
 0x944   :  { %v1330_v17 = vmul.f32 %v2149_v16, %v2145_v4  ;;  %2060 = vmatprep.subr.mxu0 %v1498_v18  ;;  %v1623_v4 = vrot.slane %v2443_v32, %v1622_v63  ;;  %v1722_v16 = vld [vmem:[%s2521_s6 + $0x10] sm:$0xff] }
 0x945   :  { %2061 = vmatpush3.msra.mxu0 %v1498_v18  ;;  %v1902_v18 = vld [vmem:[%s2520_s5] ss:$0 sm:$0xff]  ;;  %s2220_s5 = smov [#allocation6]  }
 0x946   :  { %2056 = vmatmul.mubr.msk.f32.vlgmr.msra.gmra.mxu1 %vm143_vm2, %v1330_v17  ;;  %2062 = vmatprep.subr.mxu0 %v1497_v19  ;;  %v1721_v17 = vld [vmem:[%s2521_s6 + $0x8] sm:$0xff]  ;;  %s1861_s6 = sshll.u32 %s2220_s5, 4  ;;  %s1862_s6 = int_to_ptr.vmem [resolvable:$true] %s1861_s6 }
 0x947   :  { %2063 = vmatpush3.msra.mxu0 %v1497_v19  ;;  %s2178_s7 = scalar_lea.vmem %s1862_s6, 256  ;;  %p2183_p6 = scmp.lt.s32.totalorder %s1862_s6, %s1862_s6 }
 0x948   :  { %2064 = vmatprep.subr.mxu0 %v1496_v20  ;;  %p2179_p5 = scmp.ne.s32.totalorder %s1862_s6, %s2178_s7  ;;  %p2184_p7 = scmp.lt.s32.totalorder %s2178_s7, %s2178_s7 }
 0x949   :  { %2065 = vmatpush3.msra.mxu0 %v1496_v20 }
 0x94a   :  { %2080 = vmatprep.subr.mxu0 %v1727_v54  ;;  %p2185_p8 = por %p2184_p7, %p2183_p6 }
 0x94c   :  { %p2186_p9 = pnand %p2185_p8, %p2179_p5 }
 0xa02   :  { %v1403_v21 = vpop.f32.mrf.mxu0 }
 0xa03   :  { %1485 = vrot.lane.b32.xlu0 %v1403_v21, %s2219_s18 }
 0xa04   :  { %v2052_v22 = vpop.f32.mrf.mxu0 }
 0xa06   :  { %v1479_v23 = vpop.f32.mrf.mxu1 }
 0xa07   :  { %1487 = vrot.lane.b32.xlu1 %v1479_v23, %s2219_s18 }
 0xa08   :  { %v2057_v24 = vpop.f32.mrf.mxu1 }
 0xa75   :  { %v1486_v25 = vpop.permute.xlu0 %1485 }
 0xa76   :  { %1492 = vst.msk [vmem:[#allocation2] sm:$0xff] %vm1491_vm5, %v1486_v25  ;;  %v1730_v25 = vsub.s32 3, %v2437_v30 }
 0xa79   :  { %v1488_v26 = vpop.permute.xlu1 %1487 }
 0xa7a   :  { %1493 = vst.msk [vmem:[#allocation2 + $0x8] sm:$0xff] %vm1491_vm5, %v1488_v26  ;;  %v1731_v26 = vrot.slane %v2443_v32, %v1730_v25 }
 0xa7d   :  { %v1494_v27 = vld [vmem:[#allocation2] sm:$0xff] }
 0xa7e   :  { %2066 = vmatprep.mubr.msk.f32.mxu0 %vm58_vm0, %v1494_v27 }
 0xa81   :  { %v1495_v28 = vld [vmem:[#allocation2 + $0x8] sm:$0xff] }
 0xa82   :  { %2067 = vmatmul.mubr.msk.f32.vlgmr.msra.gmra.mxu0 %vm58_vm0, %v1495_v28 }
 0xa83   :  { %2081 = vmatpush3.msra.mxu0 %v1727_v54 }
 0xa84   :  { %2082 = vmatprep.subr.mxu0 %v1726_v55 }
 0xa85   :  { %2083 = vmatpush3.msra.mxu0 %v1726_v55 }
 0xa86   :  { %2084 = vmatprep.subr.mxu0 %v1725_v56 }
 0xa87   :  { %2085 = vmatpush3.msra.mxu0 %v1725_v56 }
 0xa88   :  { %2086 = vmatprep.subr.mxu0 %v1724_v6 }
 0xa89   :  { %2087 = vmatpush3.msra.mxu0 %v1724_v6 }
 0xa8a   :  { %2088 = vmatprep.subr.mxu0 %v1723_v15 }
 0xa8b   :  { %2089 = vmatpush3.msra.mxu0 %v1723_v15 }
 0xa8c   :  { %2090 = vmatprep.subr.mxu0 %v1722_v16 }
 0xa8d   :  { %2091 = vmatpush3.msra.mxu0 %v1722_v16 }
 0xa8e   :  { %2092 = vmatprep.subr.mxu0 %v1721_v17 }
 0xa8f   :  { %2093 = vmatpush3.msra.mxu0 %v1721_v17 }
 0xa90   :  { %2094 = vmatprep.subr.mxu0 %v1720_v11 }
 0xa91   :  { %2095 = vmatpush3.msra.mxu0 %v1720_v11 }
 0xb42   :  { %v2068_v34 = vpop.f32.mrf.mxu0 }
 0xb43   :  { %v1582_v35 = vadd.f32 %v2068_v34, %v1503_v33 }
 0xb44   :  { %v1576_v36 = vpop.f32.mrf.mxu0 }
 0xb45   :  { %v1577_v37 = vadd.f32 %v1576_v36, %v1503_v33  ;;  %v1586_v38 = vadd.f32 %v1582_v35, %v2288_v5 }
 0xb47   :  { %v1590_v39 = vsel %vm58_vm0, %v1586_v38, 0.0  ;;  %v1585_v40 = vadd.f32 %v1577_v37, %v2278_v2  ;;  %v1629_v2 = vld [vmem:[%s2519_s4 + $0x18] sm:$0xff] }
 0xb48   :  { %1591 = vadd.xlane.f32.xlu1 %v1590_v39  ;;  %2069 = vmatprep.subr.mxu1 %v1629_v2 }
 0xb49   :  { %v1587_v41 = vsel %vm58_vm0, %v1585_v40, 0.0  ;;  %2070 = vmatpush3.msra.mxu1 %v1629_v2 }
 0xb4a   :  { %1588 = vadd.xlane.f32.xlu0 %v1587_v41  ;;  %2071 = vmatprep.subr.mxu1 %v1628_v51 }
 0xb4b   :  { %2072 = vmatpush3.msra.mxu1 %v1628_v51  ;;  %v1844_v51 = vsub.s32 4, %v2437_v30 }
 0xb4c   :  { %2073 = vmatprep.subr.mxu1 %v1627_v52 }
 0xb4d   :  { %2074 = vmatpush3.msra.mxu1 %v1627_v52  ;;  %v1850_v52 = vsub.s32 5, %v2437_v30 }
 0xb4e   :  { %2075 = vmatprep.subr.mxu1 %v1626_v53 }
 0xb4f   :  { %2076 = vmatpush3.msra.mxu1 %v1626_v53  ;;  %v1845_v53 = vrot.slane %v2443_v32, %v1844_v51  ;;  %v1851_v56 = vrot.slane %v2443_v32, %v1850_v52 }
 0xbd1   :  { %v1592_v42 = vpop.xlane.xlu1 %1591 }
 0xbd2   :  { %v1595_v43 = vmul.f32 0.03125, %v1592_v42 }
 0xbd3   :  { %v1589_v44 = vpop.xlane.xlu0 %1588 }
 0xbd4   :  { %v1594_v45 = vmul.f32 0.03125, %v1589_v44  ;;  %v1597_v46 = vsub.f32 %v1586_v38, %v1595_v43 }
 0xbd6   :  { %v1596_v47 = vsub.f32 %v1585_v40, %v1594_v45  ;;  %v1599_v50 = vmul.f32 %v1597_v46, %v1597_v46 }
 0xbd8   :  { %v1598_v48 = vmul.f32 %v1596_v47, %v1596_v47  ;;  %v1603_v5 = vsel %vm58_vm0, %v1599_v50, 0.0 }
 0xbda   :  { %v1600_v49 = vsel %vm58_vm0, %v1598_v48, 0.0 }
 0xbdb   :  { %1601 = vadd.xlane.f32.xlu0 %v1600_v49 }
 0xbdf   :  { %1604 = vadd.xlane.f32.xlu0 %v1603_v5 }
 0xc64   :  { %v1602_v57 = vpop.xlane.xlu0 %1601 }
 0xc65   :  { %v1606_v58 = vmul.f32 0.03125, %v1602_v57 }
 0xc67   :  { %v1608_v59 = vadd.f32 1e-05, %v1606_v58 }
 0xc68   :  { %v1605_v60 = vpop.xlane.xlu0 %1604 }
 0xc69   :  { %2150 = vrsqrt.f32 %v1608_v59  ;;  %v1607_v61 = vmul.f32 0.03125, %v1605_v60 }
 0xc6b   :  { %v1609_v62 = vadd.f32 1e-05, %v1607_v61 }
 0xc6d   :  { %2152 = vrsqrt.f32 %v1609_v62 }
 0xc76   :  { %v2151_v1 = vpop.eup %2150 }
 0xc77   :  { %v1612_v3 = vmul.f32 %v2151_v1, %v1596_v47 }
 0xc79   :  { %v1618_v7 = vmul.f32 %v1617_v0, %v1612_v3 }
 0xc7a   :  { %v2153_v8 = vpop.eup %2152 }
 0xc7b   :  { %v1613_v9 = vmul.f32 %v2153_v8, %v1597_v46  ;;  %v1624_v12 = vadd.f32 %v1623_v4, %v1618_v7 }
 0xc7d   :  { %v1619_v13 = vmul.f32 %v1617_v0, %v1613_v9  ;;  %2077 = vmatprep.mubr.msk.f32.mxu1 %vm58_vm0, %v1624_v12 }
 0xc7f   :  { %v1625_v14 = vadd.f32 %v1623_v4, %v1619_v13 }
 0xc81   :  { %2078 = vmatmul.mubr.msk.f32.vlgmr.msra.gmra.mxu1 %vm58_vm0, %v1625_v14 }
 0xd41   :  { %v2079_v19 = vpop.f32.mrf.mxu1 }
 0xd42   :  { %v1715_v20 = vadd.f32 %v2079_v19, %v1902_v18 }
 0xd43   :  { %v1709_v21 = vpop.f32.mrf.mxu1 }
 0xd44   :  { %v1710_v22 = vadd.f32 %v1902_v18, %v1709_v21  ;;  %v1719_v24 = vmax.f32 %v1715_v20, 0.0 }
 0xd46   :  { %v1718_v23 = vmax.f32 %v1710_v22, 0.0 }
 0xd48   :  { %2096 = vmatprep.mubr.msk.f32.mxu0 %vm1732_vm6, %v1718_v23 }
 0xd49   :  { %2097 = vmatmul.mubr.msk.f32.vlgmr.msra.gmra.mxu0 %vm1732_vm6, %v1719_v24 }
 0xe09   :  { %v2098_v27 = vpop.f32.mrf.mxu0 }
 0xe0a   :  { %v1811_v28 = vadd.f32 %v2098_v27, %v1731_v26 }
 0xe0b   :  { %v1805_v29 = vpop.f32.mrf.mxu0 }
 0xe0c   :  { %v1806_v31 = vadd.f32 %v1805_v29, %v1731_v26  ;;  %v1815_v33 = vadd.f32 %v1811_v28, %v1625_v14 }
 0xe0e   :  { %v1819_v34 = vsel %vm58_vm0, %v1815_v33, 0.0  ;;  %v1814_v35 = vadd.f32 %v1806_v31, %v1624_v12 }
 0xe0f   :  { %1820 = vadd.xlane.f32.xlu0 %v1819_v34 }
 0xe10   :  { %v1816_v36 = vsel %vm58_vm0, %v1814_v35, 0.0 }
 0xe11   :  { %1817 = vadd.xlane.f32.xlu1 %v1816_v36 }
 0xe98   :  { %v1821_v37 = vpop.xlane.xlu0 %1820 }
 0xe99   :  { %v1823_v38 = vmul.f32 0.03125, %v1821_v37 }
 0xe9a   :  { %v1818_v39 = vpop.xlane.xlu1 %1817 }
 0xe9b   :  { %v1825_v40 = vsub.f32 %v1815_v33, %v1823_v38  ;;  %v1822_v41 = vmul.f32 0.03125, %v1818_v39 }
 0xe9d   :  { %v1824_v42 = vsub.f32 %v1814_v35, %v1822_v41  ;;  %v1827_v43 = vmul.f32 %v1825_v40, %v1825_v40 }
 0xe9f   :  { %v1831_v44 = vsel %vm58_vm0, %v1827_v43, 0.0  ;;  %v1826_v45 = vmul.f32 %v1824_v42, %v1824_v42 }
 0xea0   :  { %1832 = vadd.xlane.f32.xlu0 %v1831_v44 }
 0xea1   :  { %v1828_v46 = vsel %vm58_vm0, %v1826_v45, 0.0 }
 0xea2   :  { %1829 = vadd.xlane.f32.xlu1 %v1828_v46 }
 0xf29   :  { %v1833_v47 = vpop.xlane.xlu0 %1832 }
 0xf2a   :  { %v1835_v48 = vmul.f32 0.03125, %v1833_v47 }
 0xf2b   :  { %v1830_v49 = vpop.xlane.xlu1 %1829 }
 0xf2c   :  { %v1837_v50 = vadd.f32 1e-05, %v1835_v48  ;;  %v1834_v5 = vmul.f32 0.03125, %v1830_v49 }
 0xf2e   :  { %2154 = vrsqrt.f32 %v1837_v50  ;;  %v1836_v2 = vadd.f32 1e-05, %v1834_v5 }
 0xf30   :  { %2156 = vrsqrt.f32 %v1836_v2 }
 0xf3b   :  { %v2155_v54 = vpop.eup %2154 }
 0xf3c   :  { %v1841_v55 = vmul.f32 %v2155_v54, %v1825_v40 }
 0xf3d   :  { %v2157_v6 = vpop.eup %2156 }
 0xf3e   :  { %v1840_v57 = vmul.f32 %v2157_v6, %v1824_v42  ;;  %v1847_v58 = vmul.f32 %v1845_v53, %v1841_v55 }
 0xf40   :  { %v1846_v59 = vmul.f32 %v1845_v53, %v1840_v57  ;;  %v1853_v60 = vadd.f32 %v1851_v56, %v1847_v58 }
 0xf42   :  { %v1852_v61 = vadd.f32 %v1851_v56, %v1846_v59  ;;  %1855 = vst.msk [vmem:[#allocation6 + $0x8] sm:$0xff] %vm58_vm0, %v1853_v60 }
 0xf44   :  { %1854 = vst.msk [vmem:[#allocation6] sm:$0xff] %vm58_vm0, %v1852_v61 }
 0xf45   :  { %2189 = shalt.err (!%p2186_p9)
}
 0xf46   :  { %1867 = dma.vmem_to_hbm [thread:$0]  %s1862_s6, 256, %s2523_s8, [#allocation5], %s2203_s30, %s2203_s30, %s2204_s9  }
 0xf47   :  { %2200 = dma.done.wait [#allocation5], 256  }
 0xf48   :  { %2201 = vsyncadd [#allocation5], 4294967040 }
 0xf49   :  { %1871 = vsyncpa [#allocation4], 1 }
 0xf4a   :  { %1872 = vsyncpa [#allocation5], 1 }

</bundles_post_ra>
